<compile_context>
chip_gen: v6e
topology: v6e:2x2x1
jax: 0.10.0
libtpu: 0.0.40
codegen_flags: <defaults>
</compile_context>

<pallas_src>
import functools
import math

import numpy as np
import jax
import jax.numpy as jnp
from jax import lax
from jax.experimental import pallas as pl
from jax.experimental.pallas import tpu as pltpu

# Gaussian kernel (kernel_size=3, sigma=1), torchvision construction:
#   x = [-1, 0, 1]; pdf = exp(-0.5 * (x/sigma)^2); kernel = pdf / pdf.sum()
_PDF_EDGE = math.exp(-0.5)
_PDF_SUM = 1.0 + 2.0 * _PDF_EDGE
K_EDGE = _PDF_EDGE / _PDF_SUM   # weight for offsets -1 / +1
K_CENTER = 1.0 / _PDF_SUM       # weight for offset 0


def _blur_matrix(n):
    """B[i, j] = weight of input j on output i for the 1-D [K_EDGE, K_CENTER, K_EDGE]
    Gaussian with reflect padding (matches torchvision GaussianBlur(3, sigma=1))."""
    b = np.zeros((n, n), dtype=np.float32)
    for i in range(n):
        b[i, i] += K_CENTER
        b[i, i - 1 if i > 0 else 1] += K_EDGE            # reflect at i == 0
        b[i, i + 1 if i < n - 1 else n - 2] += K_EDGE    # reflect at i == n-1
    return b


def _cloud_kernel(*refs, mxu_h, mxu_w):
    refs = list(refs)
    x_ref = refs.pop(0)
    bh_ref = refs.pop(0) if mxu_h else None
    bw_ref = refs.pop(0) if mxu_w else None
    o_ref = refs.pop(0)

    H, W = x_ref.shape                      # one (H, W) channel plane
    x = x_ref[...].astype(jnp.float32)

    row = lax.broadcasted_iota(jnp.int32, (H, 1), 0)
    col = lax.broadcasted_iota(jnp.int32, (1, W), 1)

    # Hoisted per-offset validity masks (reused by erosion + dilation). Out-of-window cells
    # behave like the pool's implicit padding: +inf for min, -inf for max.
    def vmask(idx, d, n):
        return (idx >= -d) if d < 0 else (idx <= n - 1 - d)

    vrow = {d: vmask(row, d, H) for d in (-1, 1, 2)}
    vcol = {d: vmask(col, d, W) for d in (-1, 1, 2)}
    row_ge3 = row >= 3
    col_ge3 = col >= 3

    def shift_h(v, d, fill):                # v[i + d, :] if in-bounds else fill
        return jnp.where(vrow[d], jnp.roll(v, -d, axis=0), fill)

    def shift_w(v, d, fill):                # v[:, j + d] if in-bounds else fill
        return jnp.where(vcol[d], jnp.roll(v, -d, axis=1), fill)

    def erode3(v):
        # 3x3 min pool == -max_pool2d(-x, 3, 1, 1); out-of-bounds cells ignored (+inf fill).
        a = jnp.minimum(v, shift_h(v, 1, jnp.inf))
        a = jnp.minimum(a, shift_h(v, -1, jnp.inf))
        b = jnp.minimum(a, shift_w(a, 1, jnp.inf))
        b = jnp.minimum(b, shift_w(a, -1, jnp.inf))
        return b

    def dilate7_h(v):
        # 7-wide max window [i-3, i+3] along H, out-of-bounds ignored:
        #   t2[i] = max v[i : i+1],  t4[i] = max v[i : i+3]   (right edge clipped via -inf fill)
        #   out[i] = max(t4[i], t4[max(i-3, 0)])              (clamped shift: exact at the top edge)
        t2 = jnp.maximum(v, shift_h(v, 1, -jnp.inf))
        t4 = jnp.maximum(t2, shift_h(t2, 2, -jnp.inf))
        left = jnp.where(row_ge3, jnp.roll(t4, 3, axis=0), t4[0:1, :])
        return jnp.maximum(t4, left)

    def dilate7_w(v):
        t2 = jnp.maximum(v, shift_w(v, 1, -jnp.inf))
        t4 = jnp.maximum(t2, shift_w(t2, 2, -jnp.inf))
        left = jnp.where(col_ge3, jnp.roll(t4, 3, axis=1), t4[:, 0:1])
        return jnp.maximum(t4, left)

    def blur(v):
        # Separable [K_EDGE, K_CENTER, K_EDGE] Gaussian with reflect padding.
        if mxu_h:    # banded matmul on the otherwise-idle MXU (small H only)
            v = jnp.dot(bh_ref[...], v, preferred_element_type=jnp.float32,
                        precision=lax.Precision.HIGHEST)
        else:        # 2-roll reflect stencil (cheaper than an O(H^2) matmul for large H)
            up, dn = jnp.roll(v, 1, axis=0), jnp.roll(v, -1, axis=0)
            lo = jnp.where(row == 0, dn, up)          # reflect at i == 0
            hi = jnp.where(row == H - 1, up, dn)      # reflect at i == H-1
            v = K_EDGE * (lo + hi) + K_CENTER * v
        if mxu_w:
            v = jnp.dot(v, bw_ref[...], preferred_element_type=jnp.float32,
                        precision=lax.Precision.HIGHEST)
        else:
            lf, rt = jnp.roll(v, 1, axis=1), jnp.roll(v, -1, axis=1)
            lo = jnp.where(col == 0, rt, lf)
            hi = jnp.where(col == W - 1, lf, rt)
            v = K_EDGE * (lo + hi) + K_CENTER * v
        return v

    y = erode3(x)                 # erosion (3x3 min)
    y = blur(y)                   # GaussianBlur(3, sigma=1)
    y = dilate7_w(dilate7_h(y))   # 7x7 dilation
    y = blur(y)                   # GaussianBlur(3, sigma=1)
    o_ref[...] = y.astype(o_ref.dtype)


def cloud_erosion_dilation(x, *, mxu_blur_max_dim=128):
    """CloudErosionDilation forward on an NCHW float image (Pallas TPU kernel)."""
    N, C, H, W = x.shape
    assert H >= 2 and W >= 2, "reflect-pad blur needs spatial dims >= 2 (same as torchvision)"
    assert jnp.issubdtype(x.dtype, jnp.floating), "cloud mask must be a float tensor"

    mxu_h = H <= mxu_blur_max_dim
    mxu_w = W <= mxu_blur_max_dim

    operands = [x]
    in_specs = [pl.BlockSpec((None, None, H, W), lambda n, c: (n, c, 0, 0))]
    if mxu_h:
        operands.append(jnp.asarray(_blur_matrix(H)))        # (H, H), left-multiply
        in_specs.append(pl.BlockSpec((H, H), lambda n, c: (0, 0)))
    if mxu_w:
        operands.append(jnp.asarray(_blur_matrix(W).T))      # (W, W), right-multiply
        in_specs.append(pl.BlockSpec((W, W), lambda n, c: (0, 0)))

    # TODO(synk): if a single (H, W) f32 plane (x ~8 live copies: 2x in + 2x out blocks +
    # stencil intermediates) approaches the scoped VMEM limit (32 MiB default on v7x), tile H
    # with a 6-row halo (1 erode + 1 blur + 3 dilate + 1 blur) and raise vmem_limit_bytes.
    # TODO(synk): when W < 128 the output stores are lane-masked; for throughput-critical
    # small-frame cases pack C (and/or N) planes along the lane axis instead.
    return pl.pallas_call(
        functools.partial(_cloud_kernel, mxu_h=mxu_h, mxu_w=mxu_w),
        out_shape=jax.ShapeDtypeStruct((N, C, H, W), x.dtype),
        grid=(N, C),
        in_specs=in_specs,
        out_specs=pl.BlockSpec((None, None, H, W), lambda n, c: (n, c, 0, 0)),
        compiler_params=pltpu.CompilerParams(
            dimension_semantics=("parallel", "parallel")),
    )(*operands)


# ------------------------- pure-JAX reference (exact, elementwise) -------------------------
def _ref_maxpool(x, k, pad):
    return lax.reduce_window(
        x, -jnp.inf, lax.max,
        window_dimensions=(1, 1, k, k),
        window_strides=(1, 1, 1, 1),
        padding=((0, 0), (0, 0), (pad, pad), (pad, pad)),
    )


def _ref_blur(x):
    def blur_axis(v, axis):
        n = v.shape[axis]
        idx = lax.broadcasted_iota(jnp.int32, v.shape, axis)
        xl = jnp.roll(v, 1, axis=axis)
        xr = jnp.roll(v, -1, axis=axis)
        left = jnp.where(idx == 0, xr, xl)        # reflect
        right = jnp.where(idx == n - 1, xl, xr)   # reflect
        return K_EDGE * left + K_CENTER * v + K_EDGE * right
    return blur_axis(blur_axis(x, 2), 3)


def _ref_forward(x):
    y = -_ref_maxpool(-x, 3, 1)
    y = _ref_blur(y)
    y = _ref_maxpool(y, 7, 3)
    y = _ref_blur(y)
    return y


if __name__ == "__main__":
    key = jax.random.PRNGKey(0)

    # Small NCHW cloud mask.
    x1 = jax.random.uniform(key, (2, 4, 16, 16), dtype=jnp.float32)
    ref1 = jax.block_until_ready(_ref_forward(x1))

    out1 = jax.block_until_ready(cloud_erosion_dilation(x1))                       # MXU blur
    assert out1.shape == ref1.shape and out1.dtype == ref1.dtype
    err1 = float(jnp.max(jnp.abs(out1 - ref1)))
    assert err1 < 1e-4, f"MXU-blur path mismatch vs reference: {err1}"

    out1r = jax.block_until_ready(cloud_erosion_dilation(x1, mxu_blur_max_dim=0))  # roll blur
    err1r = float(jnp.max(jnp.abs(out1r - ref1)))
    assert err1r < 1e-4, f"roll-blur path mismatch vs reference: {err1r}"

    # Non-square / non-multiple-of-8 spatial shape for boundary coverage.
    x2 = jax.random.uniform(jax.random.PRNGKey(1), (1, 3, 24, 40), dtype=jnp.float32)
    ref2 = jax.block_until_ready(_ref_forward(x2))
    out2 = jax.block_until_ready(cloud_erosion_dilation(x2))
    err2 = float(jnp.max(jnp.abs(out2 - ref2)))
    assert err2 < 1e-4, f"non-square mismatch vs reference: {err2}"

    print("KERNEL_OK")
</pallas_src>

<mosaic_0001>
module attributes {stable_mosaic.version = 11 : i64} {
  func.func @_cloud_kernel(%arg0: i32, %arg1: i32, %arg2: memref<1x1x16x16xf32, #tpu.memory_space<vmem>>, %arg3: memref<16x16xf32, #tpu.memory_space<vmem>>, %arg4: memref<16x16xf32, #tpu.memory_space<vmem>>, %arg5: memref<1x1x16x16xf32, #tpu.memory_space<vmem>>) attributes {dimension_semantics = [#tpu.dimension_semantics<parallel>, #tpu.dimension_semantics<parallel>], iteration_bounds = array<i64: 2, 4>, scalar_prefetch = 0 : i64, scratch_operands = 0 : i64, tpu.core_type = #tpu.core_type<tc>, window_params = [{transform_indices = @transform_0, window_bounds = array<i64: 1, 1, 16, 16>}, {pipeline_mode = #tpu.pipeline_mode<synchronous>, transform_indices = @transform_1, window_bounds = array<i64: 16, 16>}, {pipeline_mode = #tpu.pipeline_mode<synchronous>, transform_indices = @transform_2, window_bounds = array<i64: 16, 16>}, {transform_indices = @transform_3, window_bounds = array<i64: 1, 1, 16, 16>}]} {
    %c0 = arith.constant 0 : index
    %c0_0 = arith.constant 0 : index
    %c0_1 = arith.constant 0 : index
    %c0_2 = arith.constant 0 : index
    %0 = vector.load %arg2[%c0, %c0_0, %c0_1, %c0_2] : memref<1x1x16x16xf32, #tpu.memory_space<vmem>>, vector<1x1x16x16xf32>
    %1 = vector.shape_cast %0 : vector<1x1x16x16xf32> to vector<16x16xf32>
    %2 = tpu.iota {dimensions = array<i32: 0>} : vector<16x1xi32>
    %3 = tpu.iota {dimensions = array<i32: 1>} : vector<1x16xi32>
    %c1_i32 = arith.constant 1 : i32
    %4 = vector.broadcast %c1_i32 : i32 to vector<16x1xi32>
    %5 = arith.cmpi sge, %2, %4 : vector<16x1xi32>
    %c14_i32 = arith.constant 14 : i32
    %6 = vector.broadcast %c14_i32 : i32 to vector<16x1xi32>
    %7 = arith.cmpi sle, %2, %6 : vector<16x1xi32>
    %c13_i32 = arith.constant 13 : i32
    %8 = vector.broadcast %c13_i32 : i32 to vector<16x1xi32>
    %9 = arith.cmpi sle, %2, %8 : vector<16x1xi32>
    %c1_i32_3 = arith.constant 1 : i32
    %10 = vector.broadcast %c1_i32_3 : i32 to vector<1x16xi32>
    %11 = arith.cmpi sge, %3, %10 : vector<1x16xi32>
    %c14_i32_4 = arith.constant 14 : i32
    %12 = vector.broadcast %c14_i32_4 : i32 to vector<1x16xi32>
    %13 = arith.cmpi sle, %3, %12 : vector<1x16xi32>
    %c13_i32_5 = arith.constant 13 : i32
    %14 = vector.broadcast %c13_i32_5 : i32 to vector<1x16xi32>
    %15 = arith.cmpi sle, %3, %14 : vector<1x16xi32>
    %c3_i32 = arith.constant 3 : i32
    %16 = vector.broadcast %c3_i32 : i32 to vector<16x1xi32>
    %17 = arith.cmpi sge, %2, %16 : vector<16x1xi32>
    %c3_i32_6 = arith.constant 3 : i32
    %18 = vector.broadcast %c3_i32_6 : i32 to vector<1x16xi32>
    %19 = arith.cmpi sge, %3, %18 : vector<1x16xi32>
    %20 = vector.extract_strided_slice %1 {offsets = [1, 0], sizes = [15, 16], strides = [1, 1]} : vector<16x16xf32> to vector<15x16xf32>
    %21 = vector.extract_strided_slice %1 {offsets = [0, 0], sizes = [1, 16], strides = [1, 1]} : vector<16x16xf32> to vector<1x16xf32>
    %22 = tpu.concatenate %20, %21 in 0 : vector<15x16xf32>, vector<1x16xf32> -> vector<16x16xf32>
    %cst = arith.constant 0x7F800000 : f32
    %23 = vector.shape_cast %7 : vector<16x1xi1> to vector<16x1xi1>
    %24 = vector.broadcast %23 : vector<16x1xi1> to vector<16x16xi1>
    %25 = vector.broadcast %cst : f32 to vector<16x16xf32>
    %26 = arith.select %24, %22, %25 : vector<16x16xi1>, vector<16x16xf32>
    %27 = arith.minimumf %1, %26 : vector<16x16xf32>
    %28 = vector.extract_strided_slice %1 {offsets = [15, 0], sizes = [1, 16], strides = [1, 1]} : vector<16x16xf32> to vector<1x16xf32>
    %29 = vector.extract_strided_slice %1 {offsets = [0, 0], sizes = [15, 16], strides = [1, 1]} : vector<16x16xf32> to vector<15x16xf32>
    %30 = tpu.concatenate %28, %29 in 0 : vector<1x16xf32>, vector<15x16xf32> -> vector<16x16xf32>
    %cst_7 = arith.constant 0x7F800000 : f32
    %31 = vector.shape_cast %5 : vector<16x1xi1> to vector<16x1xi1>
    %32 = vector.broadcast %31 : vector<16x1xi1> to vector<16x16xi1>
    %33 = vector.broadcast %cst_7 : f32 to vector<16x16xf32>
    %34 = arith.select %32, %30, %33 : vector<16x16xi1>, vector<16x16xf32>
    %35 = arith.minimumf %27, %34 : vector<16x16xf32>
    %36 = vector.extract_strided_slice %35 {offsets = [0, 1], sizes = [16, 15], strides = [1, 1]} : vector<16x16xf32> to vector<16x15xf32>
    %37 = vector.extract_strided_slice %35 {offsets = [0, 0], sizes = [16, 1], strides = [1, 1]} : vector<16x16xf32> to vector<16x1xf32>
    %38 = tpu.concatenate %36, %37 in 1 : vector<16x15xf32>, vector<16x1xf32> -> vector<16x16xf32>
    %cst_8 = arith.constant 0x7F800000 : f32
    %39 = vector.shape_cast %13 : vector<1x16xi1> to vector<1x16xi1>
    %40 = vector.broadcast %39 : vector<1x16xi1> to vector<16x16xi1>
    %41 = vector.broadcast %cst_8 : f32 to vector<16x16xf32>
    %42 = arith.select %40, %38, %41 : vector<16x16xi1>, vector<16x16xf32>
    %43 = arith.minimumf %35, %42 : vector<16x16xf32>
    %44 = vector.extract_strided_slice %35 {offsets = [0, 15], sizes = [16, 1], strides = [1, 1]} : vector<16x16xf32> to vector<16x1xf32>
    %45 = vector.extract_strided_slice %35 {offsets = [0, 0], sizes = [16, 15], strides = [1, 1]} : vector<16x16xf32> to vector<16x15xf32>
    %46 = tpu.concatenate %44, %45 in 1 : vector<16x1xf32>, vector<16x15xf32> -> vector<16x16xf32>
    %cst_9 = arith.constant 0x7F800000 : f32
    %47 = vector.shape_cast %11 : vector<1x16xi1> to vector<1x16xi1>
    %48 = vector.broadcast %47 : vector<1x16xi1> to vector<16x16xi1>
    %49 = vector.broadcast %cst_9 : f32 to vector<16x16xf32>
    %50 = arith.select %48, %46, %49 : vector<16x16xi1>, vector<16x16xf32>
    %51 = arith.minimumf %43, %50 : vector<16x16xf32>
    %c0_10 = arith.constant 0 : index
    %c0_11 = arith.constant 0 : index
    %52 = vector.load %arg3[%c0_10, %c0_11] : memref<16x16xf32, #tpu.memory_space<vmem>>, vector<16x16xf32>
    %cst_12 = arith.constant dense<0.000000e+00> : vector<16x16xf32>
    %53 = tpu.matmul %52, %51, %cst_12 {dimension_numbers = #tpu.dot_dimension_numbers<[1], [0], [0], [1], [0, 0, 1, 1], [], []>, precision = #tpu.contract_precision<fp32>} : vector<16x16xf32>, vector<16x16xf32>, vector<16x16xf32> -> vector<16x16xf32>
    %c0_13 = arith.constant 0 : index
    %c0_14 = arith.constant 0 : index
    %54 = vector.load %arg4[%c0_13, %c0_14] : memref<16x16xf32, #tpu.memory_space<vmem>>, vector<16x16xf32>
    %cst_15 = arith.constant dense<0.000000e+00> : vector<16x16xf32>
    %55 = tpu.matmul %53, %54, %cst_15 {dimension_numbers = #tpu.dot_dimension_numbers<[1], [0], [0], [1], [0, 0, 1, 1], [], []>, precision = #tpu.contract_precision<fp32>} : vector<16x16xf32>, vector<16x16xf32>, vector<16x16xf32> -> vector<16x16xf32>
    %56 = vector.extract_strided_slice %55 {offsets = [1, 0], sizes = [15, 16], strides = [1, 1]} : vector<16x16xf32> to vector<15x16xf32>
    %57 = vector.extract_strided_slice %55 {offsets = [0, 0], sizes = [1, 16], strides = [1, 1]} : vector<16x16xf32> to vector<1x16xf32>
    %58 = tpu.concatenate %56, %57 in 0 : vector<15x16xf32>, vector<1x16xf32> -> vector<16x16xf32>
    %cst_16 = arith.constant 0xFF800000 : f32
    %59 = vector.shape_cast %7 : vector<16x1xi1> to vector<16x1xi1>
    %60 = vector.broadcast %59 : vector<16x1xi1> to vector<16x16xi1>
    %61 = vector.broadcast %cst_16 : f32 to vector<16x16xf32>
    %62 = arith.select %60, %58, %61 : vector<16x16xi1>, vector<16x16xf32>
    %63 = arith.maximumf %55, %62 : vector<16x16xf32>
    %64 = vector.extract_strided_slice %63 {offsets = [2, 0], sizes = [14, 16], strides = [1, 1]} : vector<16x16xf32> to vector<14x16xf32>
    %65 = vector.extract_strided_slice %63 {offsets = [0, 0], sizes = [2, 16], strides = [1, 1]} : vector<16x16xf32> to vector<2x16xf32>
    %66 = tpu.concatenate %64, %65 in 0 : vector<14x16xf32>, vector<2x16xf32> -> vector<16x16xf32>
    %cst_17 = arith.constant 0xFF800000 : f32
    %67 = vector.shape_cast %9 : vector<16x1xi1> to vector<16x1xi1>
    %68 = vector.broadcast %67 : vector<16x1xi1> to vector<16x16xi1>
    %69 = vector.broadcast %cst_17 : f32 to vector<16x16xf32>
    %70 = arith.select %68, %66, %69 : vector<16x16xi1>, vector<16x16xf32>
    %71 = arith.maximumf %63, %70 : vector<16x16xf32>
    %72 = vector.extract_strided_slice %71 {offsets = [13, 0], sizes = [3, 16], strides = [1, 1]} : vector<16x16xf32> to vector<3x16xf32>
    %73 = vector.extract_strided_slice %71 {offsets = [0, 0], sizes = [13, 16], strides = [1, 1]} : vector<16x16xf32> to vector<13x16xf32>
    %74 = tpu.concatenate %72, %73 in 0 : vector<3x16xf32>, vector<13x16xf32> -> vector<16x16xf32>
    %75 = vector.extract_strided_slice %71 {offsets = [0, 0], sizes = [1, 16], strides = [1, 1]} : vector<16x16xf32> to vector<1x16xf32>
    %76 = vector.shape_cast %17 : vector<16x1xi1> to vector<16x1xi1>
    %77 = vector.broadcast %76 : vector<16x1xi1> to vector<16x16xi1>
    %78 = vector.shape_cast %75 : vector<1x16xf32> to vector<1x16xf32>
    %79 = vector.broadcast %78 : vector<1x16xf32> to vector<16x16xf32>
    %80 = arith.select %77, %74, %79 : vector<16x16xi1>, vector<16x16xf32>
    %81 = arith.maximumf %71, %80 : vector<16x16xf32>
    %82 = vector.extract_strided_slice %81 {offsets = [0, 1], sizes = [16, 15], strides = [1, 1]} : vector<16x16xf32> to vector<16x15xf32>
    %83 = vector.extract_strided_slice %81 {offsets = [0, 0], sizes = [16, 1], strides = [1, 1]} : vector<16x16xf32> to vector<16x1xf32>
    %84 = tpu.concatenate %82, %83 in 1 : vector<16x15xf32>, vector<16x1xf32> -> vector<16x16xf32>
    %cst_18 = arith.constant 0xFF800000 : f32
    %85 = vector.shape_cast %13 : vector<1x16xi1> to vector<1x16xi1>
    %86 = vector.broadcast %85 : vector<1x16xi1> to vector<16x16xi1>
    %87 = vector.broadcast %cst_18 : f32 to vector<16x16xf32>
    %88 = arith.select %86, %84, %87 : vector<16x16xi1>, vector<16x16xf32>
    %89 = arith.maximumf %81, %88 : vector<16x16xf32>
    %90 = vector.extract_strided_slice %89 {offsets = [0, 2], sizes = [16, 14], strides = [1, 1]} : vector<16x16xf32> to vector<16x14xf32>
    %91 = vector.extract_strided_slice %89 {offsets = [0, 0], sizes = [16, 2], strides = [1, 1]} : vector<16x16xf32> to vector<16x2xf32>
    %92 = tpu.concatenate %90, %91 in 1 : vector<16x14xf32>, vector<16x2xf32> -> vector<16x16xf32>
    %cst_19 = arith.constant 0xFF800000 : f32
    %93 = vector.shape_cast %15 : vector<1x16xi1> to vector<1x16xi1>
    %94 = vector.broadcast %93 : vector<1x16xi1> to vector<16x16xi1>
    %95 = vector.broadcast %cst_19 : f32 to vector<16x16xf32>
    %96 = arith.select %94, %92, %95 : vector<16x16xi1>, vector<16x16xf32>
    %97 = arith.maximumf %89, %96 : vector<16x16xf32>
    %98 = vector.extract_strided_slice %97 {offsets = [0, 13], sizes = [16, 3], strides = [1, 1]} : vector<16x16xf32> to vector<16x3xf32>
    %99 = vector.extract_strided_slice %97 {offsets = [0, 0], sizes = [16, 13], strides = [1, 1]} : vector<16x16xf32> to vector<16x13xf32>
    %100 = tpu.concatenate %98, %99 in 1 : vector<16x3xf32>, vector<16x13xf32> -> vector<16x16xf32>
    %101 = vector.extract_strided_slice %97 {offsets = [0, 0], sizes = [16, 1], strides = [1, 1]} : vector<16x16xf32> to vector<16x1xf32>
    %102 = vector.shape_cast %19 : vector<1x16xi1> to vector<1x16xi1>
    %103 = vector.broadcast %102 : vector<1x16xi1> to vector<16x16xi1>
    %104 = vector.shape_cast %101 : vector<16x1xf32> to vector<16x1xf32>
    %105 = vector.broadcast %104 : vector<16x1xf32> to vector<16x16xf32>
    %106 = arith.select %103, %100, %105 : vector<16x16xi1>, vector<16x16xf32>
    %107 = arith.maximumf %97, %106 : vector<16x16xf32>
    %c0_20 = arith.constant 0 : index
    %c0_21 = arith.constant 0 : index
    %108 = vector.load %arg3[%c0_20, %c0_21] : memref<16x16xf32, #tpu.memory_space<vmem>>, vector<16x16xf32>
    %cst_22 = arith.constant dense<0.000000e+00> : vector<16x16xf32>
    %109 = tpu.matmul %108, %107, %cst_22 {dimension_numbers = #tpu.dot_dimension_numbers<[1], [0], [0], [1], [0, 0, 1, 1], [], []>, precision = #tpu.contract_precision<fp32>} : vector<16x16xf32>, vector<16x16xf32>, vector<16x16xf32> -> vector<16x16xf32>
    %c0_23 = arith.constant 0 : index
    %c0_24 = arith.constant 0 : index
    %110 = vector.load %arg4[%c0_23, %c0_24] : memref<16x16xf32, #tpu.memory_space<vmem>>, vector<16x16xf32>
    %cst_25 = arith.constant dense<0.000000e+00> : vector<16x16xf32>
    %111 = tpu.matmul %109, %110, %cst_25 {dimension_numbers = #tpu.dot_dimension_numbers<[1], [0], [0], [1], [0, 0, 1, 1], [], []>, precision = #tpu.contract_precision<fp32>} : vector<16x16xf32>, vector<16x16xf32>, vector<16x16xf32> -> vector<16x16xf32>
    %c0_26 = arith.constant 0 : index
    %c0_27 = arith.constant 0 : index
    %c0_28 = arith.constant 0 : index
    %c0_29 = arith.constant 0 : index
    %112 = vector.load %arg5[%c0_26, %c0_27, %c0_28, %c0_29] : memref<1x1x16x16xf32, #tpu.memory_space<vmem>>, vector<1x1x16x16xf32>
    %113 = vector.shape_cast %112 : vector<1x1x16x16xf32> to vector<16x16xf32>
    %114 = vector.shape_cast %111 : vector<16x16xf32> to vector<1x1x16x16xf32>
    tpu.vector_store %arg5[%c0_26, %c0_27, %c0_28, %c0_29], %114 {strides = array<i32>} : memref<1x1x16x16xf32, #tpu.memory_space<vmem>>, vector<1x1x16x16xf32>,
    return
  }
  func.func @transform_0(%arg0: i32, %arg1: i32) -> (i32, i32, i32, i32) {
    %c0_i32 = arith.constant 0 : i32
    %c0_i32_0 = arith.constant 0 : i32
    %c0_i32_1 = arith.constant 0 : i32
    return %arg0, %arg1, %c0_i32, %c0_i32_0 : i32, i32, i32, i32
  }
  func.func @transform_1(%arg0: i32, %arg1: i32) -> (i32, i32) {
    %c0_i32 = arith.constant 0 : i32
    %c0_i32_0 = arith.constant 0 : i32
    %c0_i32_1 = arith.constant 0 : i32
    return %c0_i32, %c0_i32_0 : i32, i32
  }
  func.func @transform_2(%arg0: i32, %arg1: i32) -> (i32, i32) {
    %c0_i32 = arith.constant 0 : i32
    %c0_i32_0 = arith.constant 0 : i32
    %c0_i32_1 = arith.constant 0 : i32
    return %c0_i32, %c0_i32_0 : i32, i32
  }
  func.func @transform_3(%arg0: i32, %arg1: i32) -> (i32, i32, i32, i32) {
    %c0_i32 = arith.constant 0 : i32
    %c0_i32_0 = arith.constant 0 : i32
    %c0_i32_1 = arith.constant 0 : i32
    return %arg0, %arg1, %c0_i32, %c0_i32_0 : i32, i32, i32, i32
  }
}

</mosaic_0001>

<bundles_post_ra>
// kernel: tpu_custom_call.1
= control target key start
LH: loop header
LB: loop body
LE: loop exit
PB: predicated region body
PF: predicated region fallthrough
CT: control target
= control target key end

     0   :  { %s3637_s0 = inlined_call_operand.hbm [shape: f32[2,4,16,16], index: 0, kind: input, shape index: {}]   ;;  %s3638_s1 = inlined_call_operand.hbm [shape: f32[16,16], index: 1, kind: input, shape index: {}]   ;;  %s3639_s2 = inlined_call_operand.hbm [shape: f32[16,16], index: 2, kind: input, shape index: {}]   ;;  %s3640_s3 = inlined_call_operand.hbm [shape: f32[2,4,16,16], index: 3, kind: output, shape index: {}]  }
   0x1   :  { %3648 = sst [smem:[#allocation15_spill]] %s3638_s1 }
   0x2   :  { %3649 = sst [smem:[#allocation16_spill]] %s3639_s2 }
   0x3   :  { %3650 = sst [smem:[#allocation17_spill]] %s3640_s3 }
   0x4   :  { %8 = vsyncpa [#allocation3], 0 }
   0x5   :  { %10 = vsyncpa [#allocation3 + $0x1], 0 }
   0x6   :  { %11 = vsyncpa [#allocation6], 0 }
   0x7   :  { %12 = vsyncpa [#allocation4], 0 }
   0x8   :  { %14 = vsyncpa [#allocation4 + $0x1], 0  ;;  %s3236_s12 = smov 0   ;;  %s3238_s13 = smov 0  }
   0x9   :  { %s3240_s14 = smov 0   ;;  %s3242_s15 = smov 0  }
   0xa   :  { %s3244_s16 = smov 0   ;;  %s3246_s17 = smov 0  }
   0xb   :  { %s3248_s18 = smov 0   ;;  %s3250_s19 = smov 0  }
   0xc LB: > { %3651 = sst [smem:[#allocation12_spill]] %s3169_s12  ;;  %s2618_s20 = sadd.s32 4294967295, %s3197_s19   ;;  %s3197_s19 = sphi %s3250_s19, %s20_s19   ;;  %s3193_s18 = sphi %s3248_s18, %s3679_s18   ;;  %s3189_s17 = sphi %s3246_s17, %s3678_s17   ;;  %s3185_s16 = sphi %s3244_s16, %s3677_s16   ;;  %s3181_s15 = sphi %s3242_s15, %s3676_s15   ;;  %s3177_s14 = sphi %s3240_s14, %s3675_s14   ;;  %s3173_s13 = sphi %s3238_s13, %s3674_s13   ;;  %s3169_s12 = sphi %s3236_s12, %s3673_s12  }
   0xd   : > { %s2619_s21 = sadd.s32 4294967294, %s3197_s19   ;;  %p54_p0 = scmp.ne.s32.totalorder %s3173_s13, %s3169_s12 }
   0xe   : > { %p3280_p1 = scmp.eq.s32.totalorder %s2618_s20, 0  ;;  %p3284_p2 = scmp.eq.s32.totalorder %s2618_s20, 7 }
   0xf   : > { %p128_p3 = scmp.eq.s32.totalorder %s2619_s21, 7  ;;  %p2620_p5 = scmp.ge.s32.totalorder %s3197_s19, 1 }
  0x10   : > { %p3290_p4 = por %p3280_p1, %p54_p0  ;;  %p135_p7 = scmp.lt.s32.totalorder %s3197_s19, 9 }
  0x11   : > { %p3295_p6 = por %p128_p3, %p54_p0  ;;  %s3199_s27 = smov [#allocation5]  }
  0x12   : > { %p3300_p8 = pnand %p2620_p5, %p135_p7  ;;  %s147_s28 = sshll.u32 %s3199_s27, 4  ;;  %s148_s28 = int_to_ptr.vmem [resolvable:$true] %s147_s28 }
  0x13   : > { %s3655_s25 = scalar_select %p3295_p6, 1, 0 }
  0x14   : > { %p2915_p9 = pneg %p3300_p8  ;;  %s3200_s30 = smov [#allocation7]  }
  0x15   : > { %3656 = sst [smem:[#allocation13_spill]] %s3655_s25  ;;  %s160_s4 = sshll.u32 %s3200_s30, 4  ;;  %s161_s4 = int_to_ptr.vmem [resolvable:$true] %s160_s4 }
  0x16   : > { %p3308_p10 = pnand %p2915_p9, %p3280_p1  ;;  %s3028_s5 = scalar_lea.vmem %s148_s28, 256 }
  0x17   : > { %p3029_p12 = scmp.ne.s32.totalorder %s148_s28, %s3028_s5  ;;  %p3036_p3 = scmp.lt.s32.totalorder %s148_s28, %s148_s28 }
  0x18   : > { %p3019_p11 = pneg %p3308_p10  ;;  %p3037_p5 = scmp.lt.s32.totalorder %s3028_s5, %s3028_s5 }
  0x1a   : > { %p3031_p13 = pnand %p3029_p12, %p3019_p11  ;;  %p3038_p7 = por %p3037_p5, %p3036_p3 }
  0x1c   : > { %p3032_p0 = pneg %p3031_p13 }
  0x1e   : > { %p3039_p9 = pnand %p3038_p7, %p3032_p0 }
  0x20   : > { %3042 = shalt.err (!%p3039_p9)
}
  0x21   : > { %s3641_s6 = smov 128   ;;  %s3642_s7 = smov 8  }
  0x22   : > { %s3659_s1 = sld [smem:[#allocation15_spill]]  ;;  %s3054_s10 = scalar_lea.vmem %s161_s4, 256 }
  0x23   : > { %p3055_p12 = scmp.ne.s32.totalorder %s161_s4, %s3054_s10  ;;  %p3062_p0 = scmp.lt.s32.totalorder %s161_s4, %s161_s4 }
  0x24   : > { %p3063_p5 = scmp.lt.s32.totalorder %s3054_s10, %s3054_s10 }
  0x25   : > { %p3057_p13 = pnand %p3055_p12, %p3019_p11 }
  0x26   : > { %p3064_p7 = por %p3063_p5, %p3062_p0 }
  0x27   : > { %p3058_p3 = pneg %p3057_p13 }
  0x28   : > { %2918 = dma.hbm_to_vmem [thread:$0]  (!%p3308_p10), %s3659_s1, 256, %s148_s28, [#allocation6], %s3641_s6, %s3641_s6, %s3642_s7  }
  0x29   : > { %p3065_p9 = pnand %p3064_p7, %p3058_p3 }
  0x2b   : > { %3068 = shalt.err (!%p3065_p9)
}
  0x2c   : > { %s3660_s2 = sld [smem:[#allocation16_spill]]  ;;  %s29_s21 = sadd.s32 1, %s3189_s17 }
  0x2d   : > { %s32_s27 = sadd.s32 1, %s3193_s18  ;;  %p30_p11 = scmp.ge.s32.totalorder %s29_s21, 4 }
  0x2e   : > { %s41_s28 = sadd.s32 1, %s3177_s14  ;;  %p48_p12 = scmp.ne.s32.totalorder %s3177_s14, %s3173_s13 }
  0x2f   : > { %p49_p13 = scmp.eq.s32.totalorder %s3197_s19, 0  ;;  %s3681_s21 = smov (%p30_p11, %s29_s21), 0 }
  0x30   : > { %3661 = sst [smem:[#allocation14_spill]] %s3681_s21  ;;  %s3683_s27 = smov (!%p30_p11, %s32_s27), %s3193_s18 }
  0x31   : > { %s37_s29 = ssub.s32 %s3189_s17, %s3681_s21  ;;  %p3347_p3 = por %p49_p13, %p48_p12 }
  0x32   : > { %2921 = dma.hbm_to_vmem [thread:$0]  (!%p3308_p10), %s3660_s2, 256, %s161_s4, [#allocation6], %s3641_s6, %s3641_s6, %s3642_s7  }
  0x33   : > { %p34_p10 = scmp.ge.s32.totalorder %s3683_s27, 2  ;;  %p3353_p0 = por %p3284_p2, %p48_p12 }
  0x34   : > { %p2932_p5 = scmp.lt.s32.totalorder %s3197_s19, 8  ;;  %s174_s5 = sand.u32 1, %s3177_s14  }
  0x35   : > { %s3663_s4 = scalar_select %p3353_p0, 1, 0 }
  0x36   : > { %s3685_s27 = smov (%p34_p10, %s3683_s27), 0  ;;  %s2624_s8 = sshll.u32 %s174_s5, 4 }
  0x37   : > { %s36_s9 = ssub.s32 %s3193_s18, %s3685_s27  ;;  %s2625_s11 = sshll.u32 %s3189_s17, 1 }
  0x38   : > { %s38_s10 = sor.u32 %s37_s29, %s36_s9  ;;  %s2626_s20 = sshll.u32 %s3193_s18, 3 }
  0x39   : > { %p39_p7 = scmp.eq.s32.totalorder %s38_s10, 0  ;;  %s184_s6 = sadd.s32 %s2626_s20, %s2625_s11 }
  0x3a   : > { %s178_s7 = scalar_lea.vmem [#allocation2], %s2624_s8  ;;  %s2627_s2 = sshll.u32 %s184_s6, 7 }
  0x3b   : > { %s187_s23 = sshll.u32 %s178_s7, 4  ;;  %s186_s12 = scalar_lea.hbm %s3637_s0, %s2627_s2  ;;  %s188_s23 = int_to_ptr.vmem [resolvable:$true] %s187_s23 }
  0x3c   : > { %s3366_s1 = scalar_select %p39_p7, %s3177_s14, %s41_s28  }
  0x3d   : > { %p3375_p2 = pnand %p2932_p5, %p3347_p3  ;;  %s175_s29 = scalar_lea.sflag [#allocation3], %s174_s5 }
  0x3e   : > { %s3082_s8 = scalar_lea.vmem %s188_s23, 256  ;;  %s3203_s6 = smov [#allocation2]  }
  0x3f   : > { %p3071_p9 = pneg %p3375_p2  ;;  %p3083_p11 = scmp.ne.s32.totalorder %s188_s23, %s3082_s8 }
  0x40   : > { %s3087_s7 = sshll.u32 %s3203_s6, 4  ;;  %s3088_s7 = int_to_ptr.vmem [resolvable:$false] %s3087_s7 }
  0x41   : > { %p3085_p12 = pnand %p3083_p11, %p3071_p9  ;;  %s3089_s28 = scalar_lea.vmem %s3088_s7, 512 }
  0x42   : > { %p3090_p10 = scmp.lt.s32.totalorder %s188_s23, %s3088_s7  ;;  %p3091_p7 = scmp.lt.s32.totalorder %s3089_s28, %s3082_s8 }
  0x43   : > { %p3086_p13 = pneg %p3085_p12 }
  0x44   : > { %p3092_p6 = por %p3091_p7, %p3090_p10 }
  0x46   : > { %p3093_p0 = pnand %p3092_p6, %p3086_p13 }
  0x48   : > { %3096 = shalt.err (!%p3093_p0)
}
  0x49   : > { %s3665_s2 = smov 8   ;;  %s3666_s25 = smov 128  }
  0x4a   : > { %2925 = dma.hbm_to_vmem [thread:$0]  (!%p3375_p2), %s186_s12, 256, %s188_s23, %s175_s29, %s3666_s25, %s3666_s25, %s3665_s2  }
  0x4b   : > { %199 = sbr.rel (%p3300_p8) target bundleno = 1503 (0x5df), region = 32  ;;  %s3389_s21 = sand.u32 (!%p3300_p8), 1, %s3173_s13  }
  0x4c   : > { %s2629_s30 = sshll.u32 (!%p3300_p8), %s3389_s21, 4  ;;  %s202_s5 = scalar_lea.sflag (!%p3300_p8), [#allocation3], %s3389_s21 }
  0x4d   : > { %s205_s9 = scalar_lea.vmem (!%p3300_p8), [#allocation2], %s2629_s30 }
  0x50   : > { %3156 = dma.done.wait (%p3290_p4), %s202_s5, 256  }
  0x51   : > { %3158 = vsyncadd (%p3290_p4), %s202_s5, 4294967040 }
  0x52   : > { %3160 = dma.done.wait (%p3280_p1), [#allocation6], 512  }
  0x53   : > { %3162 = vsyncadd (%p3280_p1), [#allocation6], 4294966784  ;;  %v238_v0 = vlaneseq  ;;  %v236_v3 = vld [vmem:[%s205_s9] sm:$0xff]  ;;  %v237_v4 = vld [vmem:[%s205_s9 + $0x8] sm:$0xff]  ;;  %vm257_vm1 = vcmask 1046528   ;;  %vm275_vm2 = vcmask 1040384  }
  0x54   : > { %v258_v5 = vrot.slane %v236_v3, 1  ;;  %v259_v6 = vrot.slane %v237_v4, 1  ;;  %v273_v7 = vrot.slane %v237_v4, 7  ;;  %v276_v8 = vrot.slane %v236_v3, 7  ;;  %v333_v16 = vld [vmem:[#allocation5] sm:$0xff]  ;;  %s3204_s3 = smov 127  }
  0x55   : > { %v3403_v1 = vshrl.u32 %v238_v0, 7  ;;  %vm335_vm4 = vcmask 130048   ;;  %s3205_s12 = smov 15   ;;  %s3206_s22 = smov 1   ;;  %v334_v26 = vld [vmem:[#allocation5 + $0x8] sm:$0xff]  ;;  %v3434_v29 = vand.u32 127, %v238_v0 }
  0x56   : > { %v260_v9 = vsel %vm257_vm1, %v258_v5, %v259_v6  ;;  %v280_v10 = vsel %vm275_vm2, %v273_v7, %v276_v8  ;;  %v264_v11 = vsel %vm257_vm1, %v259_v6, %v258_v5  ;;  %v277_v15 = vsel %vm275_vm2, %v276_v8, %v273_v7  ;;  %s3207_s24 = smov 113   ;;  %v845_v0 = vld [vmem:[#allocation7 + $0x8] sm:$0xff]  ;;  %s3209_s26 = smov 14  }
  0x57   : > { %v3406_v2 = vadd.s32 8, %v3403_v1  ;;  %vm243_vm0 = vcmp.ge.s32.totalorder %v3403_v1, 1  ;;  %v271_v12 = vmin.f32 %v236_v3, %v260_v9  ;;  %v337_v19 = vsel %vm335_vm4, %v333_v16, 0  ;;  %s3210_s10 = smov 126   ;;  %s3211_s11 = smov 115  }
  0x58   : > { %v285_v13 = vsel %vm243_vm0, %v280_v10, inf  ;;  %v3415_v21 = vand.u32 4294901760, %v337_v19  ;;  %v340_v27 = vsel %vm335_vm4, %v334_v26, 0  ;;  %vm303_vm5 = vcmask 121856   ;;  %s3212_s20 = smov 3   ;;  %s2634_s23 = sshll.u32 %s3181_s15, 1 }
  0x59   : > { %vm246_vm3 = vcmp.le.s32.totalorder %v3406_v2, 14  ;;  %v287_v18 = vmin.f32 %v271_v12, %v285_v13  ;;  %v3436_v31 = vand.u32 4294901760, %v340_v27  ;;  %vm250_vm6 = vcmp.le.s32.totalorder %v3434_v29, 14  ;;  %s2635_s29 = sshll.u32 %s3185_s16, 3  ;;  %s235_s7 = scalar_lea.vmem [#allocation8], %s2629_s30 }
  0x5a   : > { %v270_v14 = vsel %vm246_vm3, %v264_v11, inf  ;;  %v3420_v22 = vsub.f32 %v337_v19, %v3415_v21  ;;  %2746 = vmatprep.mubr.f32.mxu1 %v3415_v21  ;;  %vm324_vm7 = vcmask 7168   ;;  %vm249_vm8 = vcmp.ge.s32.totalorder %v3434_v29, 1  ;;  %s2506_s8 = sadd.s32 %s2635_s29, %s2634_s23  ;;  %s2509_s28 = sshll.u32 %s235_s7, 4  ;;  %s3582_s28 = int_to_ptr.vmem [resolvable:$true] %s2509_s28 }
  0x5b   : > { %v272_v17 = vmin.f32 %v237_v4, %v270_v14  ;;  %291 = vrot.lane.b32.xlu1 %v287_v18, %s3204_s3  ;;  %v3441_v35 = vsub.f32 %v340_v27, %v3436_v31  ;;  %v3466_v3 = vand.u32 4294901760, %v845_v0  ;;  %v844_v4 = vld [vmem:[#allocation7] sm:$0xff]  ;;  %vm1369_vm9 = vcmask 1045504   ;;  %s2636_s6 = sshll.u32 %s2506_s8, 7  ;;  %s3667_s2 = sld [smem:[#allocation17_spill]] }
  0x5c   : > { %v3424_v23 = vand.u32 4294901760, %v3420_v22  ;;  %v3471_v6 = vand.u32 4294901760, %v844_v4  ;;  %vm248_vm10 = vcmp.le.s32.totalorder %v3406_v2, 13  ;;  %vm1389_vm11 = vcmask 1042432   ;;  %s2494_s30 = scalar_lea.sflag [#allocation4], %s3389_s21  ;;  %s3097_s5 = scalar_lea.vmem %s3582_s28, 256 }
  0x5d   : > { %v288_v20 = vmin.f32 %v272_v17, %v277_v15  ;;  %v3448_v42 = vand.u32 4294901760, %v3441_v35  ;;  %v3469_v5 = vsub.f32 %v845_v0, %v3466_v3  ;;  %vm252_vm12 = vcmp.ge.s32.totalorder %v3403_v1, 3  ;;  %p3098_p1 = scmp.ne.s32.totalorder %s3582_s28, %s3097_s5  ;;  %p3668_p4 = scmp.ne.s32.totalorder %s3663_s4, 0 }
  0x5e   : > { %v412_v24 = vsub.f32 %v3420_v22, %v3424_v23  ;;  %v3479_v8 = vsub.f32 %v844_v4, %v3471_v6  ;;  %vm1441_vm13 = vcmask 113664   ;;  %vm251_vm14 = vcmp.le.s32.totalorder %v3434_v29, 13  ;;  %s3213_s9 = smov [#allocation8]  }
  0x5f   : > { %293 = vrot.lane.b32.xlu0 %v288_v20, %s3204_s3  ;;  %297 = vrot.lane.b32.xlu1 %v287_v18, %s3205_s12  ;;  %v422_v51 = vsub.f32 %v3441_v35, %v3448_v42  ;;  %v3476_v7 = vand.u32 4294901760, %v3469_v5  ;;  %vm1464_vm15 = vcmask 23552   ;;  %vm254_vm0 = vcmp.ge.s32.totalorder %v3434_v29, 3  ;;  %p3099_p6 = pnand %p3098_p1, %p3668_p4 }
  0x60   : > { %v3430_v25 = vand.u32 4294901760, %v412_v24  ;;  %v3486_v10 = vand.u32 4294901760, %v3479_v8 }
  0x61   : > { %v3454_v56 = vand.u32 4294901760, %v422_v51  ;;  %v971_v9 = vsub.f32 %v3469_v5, %v3476_v7  ;;  %s3580_s25 = scalar_lea.hbm %s3667_s2, %s2636_s6  ;;  %p3100_p8 = pneg %p3099_p6 }
  0x62   : > { %2739 = vmatprep.mubr.f32.mxu0 %v3430_v25  ;;  %v978_v12 = vsub.f32 %v3479_v8, %v3486_v10 }
  0x63   : > { %299 = vrot.lane.b32.xlu0 %v288_v20, %s3205_s12  ;;  %320 = vrot.lane.b32.xlu1 %v288_v20, %s3206_s22  ;;  %v3489_v11 = vand.u32 4294901760, %v971_v9 }
  0x64   : > { %v3494_v13 = vand.u32 4294901760, %v978_v12 }
  0x67   : > { %314 = vrot.lane.b32.xlu0 %v288_v20, %s3207_s24  ;;  %318 = vrot.lane.b32.xlu1 %v287_v18, %s3206_s22 }
  0x6b   : > { %312 = vrot.lane.b32.xlu0 %v287_v18, %s3207_s24 }
  0xcd   : > { %v292_v28 = vpop.permute.xlu1 %291 }
  0xd1   : > { %v294_v30 = vpop.permute.xlu0 %293  ;;  %v298_v32 = vpop.permute.xlu1 %297 }
  0xd2   : > { %v304_v37 = vsel %vm303_vm5, %v292_v28, %v298_v32 }
  0xd3   : > { %v308_v43 = vsel %vm250_vm6, %v304_v37, inf }
  0xd4   : > { %v310_v48 = vmin.f32 %v287_v18, %v308_v43 }
  0xd5   : > { %v300_v33 = vpop.permute.xlu0 %299  ;;  %v321_v38 = vpop.permute.xlu1 %320 }
  0xd6   : > { %v305_v34 = vsel %vm303_vm5, %v294_v30, %v300_v33 }
  0xd7   : > { %v309_v36 = vsel %vm250_vm6, %v305_v34, inf }
  0xd8   : > { %v311_v40 = vmin.f32 %v288_v20, %v309_v36 }
  0xd9   : > { %v315_v39 = vpop.permute.xlu0 %314  ;;  %v319_v46 = vpop.permute.xlu1 %318 }
  0xda   : > { %v326_v41 = vsel %vm324_vm7, %v315_v39, %v321_v38 }
  0xdb   : > { %v330_v44 = vsel %vm249_vm8, %v326_v41, inf }
  0xdc   : > { %v332_v45 = vmin.f32 %v311_v40, %v330_v44 }
  0xdd   : > { %v313_v47 = vpop.permute.xlu0 %312 }
  0xde   : > { %v371_v49 = vand.u32 4294901760, %v332_v45  ;;  %v325_v50 = vsel %vm324_vm7, %v313_v47, %v319_v46 }
  0xdf   : > { %v329_v52 = vsel %vm249_vm8, %v325_v50, inf }
  0xe0   : > { %v459_v53 = vsub.f32 %v332_v45, %v371_v49  ;;  %v331_v54 = vmin.f32 %v310_v48, %v329_v52  ;;  %2735 = vmatprep.subr.mxu0 %v371_v49 }
  0xe1   : > { %2736 = vmatpush3.msra.mxu0 %v371_v49 }
  0xe2   : > { %v374_v55 = vand.u32 4294901760, %v331_v54  ;;  %v460_v57 = vand.u32 4294901760, %v459_v53 }
  0xe4   : > { %v466_v58 = vsub.f32 %v331_v54, %v374_v55  ;;  %2737 = vmatprep.subr.mxu0 %v374_v55  ;;  %v461_v59 = vsub.f32 %v459_v53, %v460_v57 }
  0xe5   : > { %2738 = vmatpush3.msra.mxu0 %v374_v55 }
  0xe6   : > { %2749 = vmatprep.subr.mxu0 %v459_v53  ;;  %2740 = vmatmul.mubr.f32.vlgmr.msra.gmra.mxu0 %v3454_v56  ;;  %v462_v60 = vand.u32 4294901760, %v461_v59  ;;  %v467_v61 = vand.u32 4294901760, %v466_v58 }
  0xe7   : > { %2750 = vmatpush3.msra.mxu0 %v459_v53  ;;  %2753 = vmatprep.mubr.f32.mxu0 %v3420_v22 }
  0xe8   : > { %2742 = vmatprep.subr.mxu1 %v462_v60  ;;  %2751 = vmatprep.subr.mxu0 %v466_v58  ;;  %v468_v62 = vsub.f32 %v466_v58, %v467_v61 }
  0xe9   : > { %2743 = vmatpush3.msra.mxu1 %v462_v60  ;;  %2752 = vmatpush3.msra.mxu0 %v466_v58 }
  0xea   : > { %2763 = vmatprep.subr.mxu0 %v460_v57  ;;  %2754 = vmatmul.mubr.f32.vlgmr.msra.gmra.mxu0 %v3441_v35  ;;  %v469_v63 = vand.u32 4294901760, %v468_v62 }
  0xeb   : > { %2764 = vmatpush3.msra.mxu0 %v460_v57  ;;  %2767 = vmatprep.mubr.f32.mxu0 %v3415_v21 }
  0xec   : > { %2744 = vmatprep.subr.mxu1 %v469_v63  ;;  %2765 = vmatprep.subr.mxu0 %v467_v61 }
  0xed   : > { %2745 = vmatpush3.msra.mxu1 %v469_v63  ;;  %2766 = vmatpush3.msra.mxu0 %v467_v61 }
  0xee   : > { %2747 = vmatmul.mubr.f32.vlgmr.msra.gmra.mxu1 %v3436_v31  ;;  %2756 = vmatprep.subr.mxu1 %v371_v49 }
  0xef   : > { %2757 = vmatpush3.msra.mxu1 %v371_v49  ;;  %2760 = vmatprep.mubr.f32.mxu1 %v3424_v23 }
  0xf0   : > { %2758 = vmatprep.subr.mxu1 %v374_v55  ;;  %2768 = vmatmul.mubr.f32.vlgmr.msra.gmra.mxu0 %v3436_v31 }
  0xf1   : > { %2759 = vmatpush3.msra.mxu1 %v374_v55  ;;  %2777 = vmatprep.subr.mxu0 %v3466_v3 }
  0xf2   : > { %2761 = vmatmul.mubr.f32.vlgmr.msra.gmra.mxu1 %v3448_v42  ;;  %2770 = vmatprep.subr.mxu1 %v371_v49 }
  0xf3   : > { %2771 = vmatpush3.msra.mxu1 %v371_v49  ;;  %2774 = vmatprep.mubr.f32.mxu1 %v3415_v21 }
  0xf4   : > { %2772 = vmatprep.subr.mxu1 %v374_v55  ;;  %2778 = vmatpush3.msra.mxu0 %v3466_v3 }
  0xf5   : > { %2773 = vmatpush3.msra.mxu1 %v374_v55  ;;  %2779 = vmatprep.subr.mxu0 %v3471_v6 }
  0xf6   : > { %2775 = vmatmul.mubr.f32.vlgmr.msra.gmra.mxu1 %v3436_v31  ;;  %2780 = vmatpush3.msra.mxu0 %v3471_v6 }
  0xf7   : > { %2791 = vmatprep.subr.mxu0 %v3469_v5  ;;  %2784 = vmatprep.subr.mxu1 %v3489_v11 }
  0xf8   : > { %2785 = vmatpush3.msra.mxu1 %v3489_v11 }
  0xf9   : > { %2786 = vmatprep.subr.mxu1 %v3494_v13 }
  0xfa   : > { %2787 = vmatpush3.msra.mxu1 %v3494_v13 }
  0xfb   : > { %2798 = vmatprep.subr.mxu1 %v3466_v3 }
 0x1a6   : > { %v2741_v14 = vpop.f32.mrf.mxu0 }
 0x1a8   : > { %v415_v15 = vpop.f32.mrf.mxu0 }
 0x1aa   : > { %v2755_v16 = vpop.f32.mrf.mxu0 }
 0x1ac   : > { %v588_v18 = vpop.f32.mrf.mxu0 }
 0x1ae   : > { %v2748_v17 = vpop.f32.mrf.mxu1 }
 0x1af   : > { %v513_v19 = vadd.f32 %v2748_v17, %v2741_v14 }
 0x1b0   : > { %v506_v20 = vpop.f32.mrf.mxu1  ;;  %v2769_v28 = vpop.f32.mrf.mxu0 }
 0x1b1   : > { %v596_v24 = vadd.f32 %v2755_v16, %v513_v19  ;;  %v507_v26 = vadd.f32 %v506_v20, %v415_v15 }
 0x1b2   : > { %v2762_v27 = vpop.f32.mrf.mxu1  ;;  %v755_v37 = vpop.f32.mrf.mxu0 }
 0x1b3   : > { %v589_v30 = vadd.f32 %v588_v18, %v507_v26  ;;  %v679_v32 = vadd.f32 %v2762_v27, %v596_v24 }
 0x1b4   : > { %v670_v33 = vpop.f32.mrf.mxu1 }
 0x1b5   : > { %v762_v34 = vadd.f32 %v2769_v28, %v679_v32  ;;  %v671_v36 = vadd.f32 %v670_v33, %v589_v30 }
 0x1b6   : > { %v2776_v38 = vpop.f32.mrf.mxu1 }
 0x1b7   : > { %v756_v39 = vadd.f32 %v755_v37, %v671_v36  ;;  %v841_v40 = vadd.f32 %v2776_v38, %v762_v34 }
 0x1b8   : > { %v834_v41 = vpop.f32.mrf.mxu1 }
 0x1b9   : > { %v850_v43 = vsel %vm335_vm4, %v841_v40, 0  ;;  %v835_v44 = vadd.f32 %v834_v41, %v756_v39 }
 0x1ba   : > { %v929_v45 = vand.u32 4294901760, %v850_v43 }
 0x1bb   : > { %v847_v46 = vsel %vm335_vm4, %v835_v44, 0 }
 0x1bc   : > { %v930_v47 = vsub.f32 %v850_v43, %v929_v45  ;;  %v919_v48 = vand.u32 4294901760, %v847_v46 }
 0x1be   : > { %v920_v49 = vsub.f32 %v847_v46, %v919_v48  ;;  %2788 = vmatprep.mubr.f32.mxu1 %v919_v48  ;;  %v931_v50 = vand.u32 4294901760, %v930_v47  ;;  %v1401_v46 = vsub.s32 0, %v3403_v1 }
 0x1bf   : > { %2789 = vmatmul.mubr.f32.vlgmr.msra.gmra.mxu1 %v929_v45 }
 0x1c0   : > { %2799 = vmatpush3.msra.mxu1 %v3466_v3  ;;  %v921_v51 = vand.u32 4294901760, %v920_v49  ;;  %v932_v52 = vsub.f32 %v930_v47, %v931_v50 }
 0x1c1   : > { %2800 = vmatprep.subr.mxu1 %v3471_v6 }
 0x1c2   : > { %2801 = vmatpush3.msra.mxu1 %v3471_v6  ;;  %2802 = vmatprep.mubr.f32.mxu1 %v921_v51  ;;  %v922_v53 = vsub.f32 %v920_v49, %v921_v51  ;;  %v933_v55 = vand.u32 4294901760, %v932_v52 }
 0x1c3   : > { %2803 = vmatmul.mubr.f32.vlgmr.msra.gmra.mxu1 %v931_v50  ;;  %2812 = vmatprep.subr.mxu1 %v3466_v3 }
 0x1c4   : > { %2813 = vmatpush3.msra.mxu1 %v3466_v3  ;;  %2816 = vmatprep.mubr.f32.mxu1 %v919_v48  ;;  %v923_v54 = vand.u32 4294901760, %v922_v53 }
 0x1c5   : > { %2814 = vmatprep.subr.mxu1 %v3471_v6 }
 0x1c6   : > { %2781 = vmatprep.mubr.f32.mxu0 %v923_v54  ;;  %2815 = vmatpush3.msra.mxu1 %v3471_v6  ;;  %v3208_v54 = vmov 0  }
 0x1c7   : > { %2782 = vmatmul.mubr.f32.vlgmr.msra.gmra.mxu0 %v933_v55  ;;  %2817 = vmatmul.mubr.f32.vlgmr.msra.gmra.mxu1 %v929_v45 }
 0x1c8   : > { %2792 = vmatpush3.msra.mxu0 %v3469_v5  ;;  %2795 = vmatprep.mubr.f32.mxu0 %v920_v49 }
 0x1c9   : > { %2793 = vmatprep.subr.mxu0 %v3479_v8  ;;  %2830 = vmatprep.mubr.f32.mxu1 %v3415_v21 }
 0x1ca   : > { %2794 = vmatpush3.msra.mxu0 %v3479_v8  ;;  %3015 = vset.pattern.permute.xlu0 %v3208_v54 }
 0x1cb   : > { %2796 = vmatmul.mubr.f32.vlgmr.msra.gmra.mxu0 %v930_v47  ;;  %2805 = vmatprep.subr.mxu0 %v3476_v7 }
 0x1cc   : > { %2806 = vmatpush3.msra.mxu0 %v3476_v7  ;;  %2809 = vmatprep.mubr.f32.mxu0 %v919_v48 }
 0x1cd   : > { %2807 = vmatprep.subr.mxu0 %v3486_v10  ;;  %3016 = vset.pattern.permute.xlu1 %v3208_v54 }
 0x1ce   : > { %2808 = vmatpush3.msra.mxu0 %v3486_v10 }
 0x1cf   : > { %2810 = vmatmul.mubr.f32.vlgmr.msra.gmra.mxu0 %v929_v45 }
 0x1d0   : > { %2823 = vmatprep.mubr.f32.mxu0 %v3430_v25 }
 0x27f   : > { %v2790_v57 = vpop.f32.mrf.mxu1 }
 0x281   : > { %v1016_v58 = vpop.f32.mrf.mxu1 }
 0x283   : > { %v2804_v59 = vpop.f32.mrf.mxu1 }
 0x285   : > { %v1180_v63 = vpop.f32.mrf.mxu1 }
 0x287   : > { %v2783_v60 = vpop.f32.mrf.mxu0  ;;  %v2818_v16 = vpop.f32.mrf.mxu1 }
 0x288   : > { %v1023_v62 = vadd.f32 %v2790_v57, %v2783_v60 }
 0x289   : > { %v925_v61 = vpop.f32.mrf.mxu0  ;;  %v1344_v26 = vpop.f32.mrf.mxu1 }
 0x28a   : > { %v1017_v4 = vadd.f32 %v1016_v58, %v925_v61 }
 0x28b   : > { %v2797_v0 = vpop.f32.mrf.mxu0 }
 0x28c   : > { %v1106_v9 = vadd.f32 %v2797_v0, %v1023_v62 }
 0x28d   : > { %v1098_v12 = vpop.f32.mrf.mxu0 }
 0x28e   : > { %v1099_v14 = vadd.f32 %v1098_v12, %v1017_v4  ;;  %v1189_v15 = vadd.f32 %v2804_v59, %v1106_v9 }
 0x28f   : > { %v2811_v17 = vpop.f32.mrf.mxu0 }
 0x290   : > { %v1272_v18 = vadd.f32 %v2811_v17, %v1189_v15  ;;  %v1181_v19 = vadd.f32 %v1180_v63, %v1099_v14 }
 0x291   : > { %v1265_v20 = vpop.f32.mrf.mxu0 }
 0x292   : > { %v1351_v24 = vadd.f32 %v2818_v16, %v1272_v18  ;;  %v1266_v25 = vadd.f32 %v1265_v20, %v1181_v19 }
 0x294   : > { %v1345_v27 = vadd.f32 %v1344_v26, %v1266_v25  ;;  %v1357_v28 = vrot.slane %v1351_v24, 1 }
 0x296   : > { %v1356_v30 = vrot.slane %v1345_v27, 1 }
 0x298   : > { %v1358_v32 = vsel %vm257_vm1, %v1356_v30, %v1357_v28  ;;  %v1362_v33 = vsel %vm257_vm1, %v1357_v28, %v1356_v30 }
 0x299   : > { %v1364_v34 = vsel %vm246_vm3, %v1362_v33, -inf  ;;  %v1365_v36 = vmax.f32 %v1345_v27, %v1358_v32 }
 0x29a   : > { %v1366_v37 = vmax.f32 %v1351_v24, %v1364_v34 }
 0x29b   : > { %v1370_v38 = vrot.slane %v1365_v36, 2 }
 0x29c   : > { %v1371_v39 = vrot.slane %v1366_v37, 2 }
 0x29e   : > { %v1372_v40 = vsel %vm1369_vm9, %v1370_v38, %v1371_v39  ;;  %v1376_v41 = vsel %vm1369_vm9, %v1371_v39, %v1370_v38 }
 0x29f   : > { %v1383_v43 = vmax.f32 %v1365_v36, %v1372_v40  ;;  %v1382_v44 = vsel %vm248_vm10, %v1376_v41, -inf }
 0x2a0   : > { %v1384_v45 = vmax.f32 %v1366_v37, %v1382_v44 }
 0x2a1   : > { %v1390_v47 = vrot.slane %v1383_v43, 5  ;;  %v1402_v51 = vrot.slane %v1383_v43, %v1401_v46 }
 0x2a2   : > { %v1386_v48 = vrot.slane %v1384_v45, 5 }
 0x2a4   : > { %v1391_v49 = vsel %vm1389_vm11, %v1390_v47, %v1386_v48  ;;  %v1394_v50 = vsel %vm1389_vm11, %v1386_v48, %v1390_v47 }
 0x2a5   : > { %v1406_v52 = vmax.f32 %v1384_v45, %v1391_v49  ;;  %v1403_v53 = vsel %vm252_vm12, %v1394_v50, %v1402_v51 }
 0x2a6   : > { %v1405_v2 = vmax.f32 %v1383_v43, %v1403_v53 }
 0x2a7   : > { %1417 = vrot.lane.b32.xlu1 %v1406_v52, %s3205_s12  ;;  %1411 = vrot.lane.b32.xlu0 %v1406_v52, %s3204_s3 }
 0x2ab   : > { %1415 = vrot.lane.b32.xlu1 %v1405_v2, %s3205_s12  ;;  %1409 = vrot.lane.b32.xlu0 %v1405_v2, %s3204_s3  ;;  %s3101_s3 = sshll.u32 %s3213_s9, 4  ;;  %s3102_s3 = int_to_ptr.vmem [resolvable:$false] %s3101_s3 }
 0x2ac   : > { %s3103_s12 = scalar_lea.vmem %s3102_s3, 512  ;;  %p3104_p3 = scmp.lt.s32.totalorder %s3582_s28, %s3102_s3 }
 0x2ad   : > { %p3105_p0 = scmp.lt.s32.totalorder %s3103_s12, %s3097_s5 }
 0x2af   : > { %p3106_p5 = por %p3105_p0, %p3104_p3 }
 0x2b1   : > { %p3107_p2 = pnand %p3106_p5, %p3100_p8 }
 0x319   : > { %v1418_v55 = vpop.permute.xlu1 %1417  ;;  %v1412_v57 = vpop.permute.xlu0 %1411 }
 0x31a   : > { %v1422_v1 = vsel %vm303_vm5, %v1412_v57, %v1418_v55 }
 0x31b   : > { %v1424_v58 = vsel %vm250_vm6, %v1422_v1, -inf }
 0x31c   : > { %v1426_v59 = vmax.f32 %v1406_v52, %v1424_v58 }
 0x31d   : > { %v1416_v60 = vpop.permute.xlu1 %1415  ;;  %v1410_v61 = vpop.permute.xlu0 %1409 }
 0x31e   : > { %v1421_v62 = vsel %vm303_vm5, %v1410_v61, %v1416_v60  ;;  %1437 = vrot.lane.b32.xlu1 %v1426_v59, %s3209_s26  ;;  %1431 = vrot.lane.b32.xlu0 %v1426_v59, %s3210_s10 }
 0x31f   : > { %v1423_v63 = vsel %vm250_vm6, %v1421_v62, -inf }
 0x320   : > { %v1425_v0 = vmax.f32 %v1405_v2, %v1423_v63 }
 0x322   : > { %1435 = vrot.lane.b32.xlu1 %v1425_v0, %s3209_s26  ;;  %1429 = vrot.lane.b32.xlu0 %v1425_v0, %s3210_s10 }
 0x390   : > { %v1438_v4 = vpop.permute.xlu1 %1437  ;;  %v1432_v9 = vpop.permute.xlu0 %1431 }
 0x391   : > { %v1443_v12 = vsel %vm1441_vm13, %v1432_v9, %v1438_v4 }
 0x392   : > { %v1447_v14 = vsel %vm251_vm14, %v1443_v12, -inf }
 0x393   : > { %v1449_v15 = vmax.f32 %v1426_v59, %v1447_v14 }
 0x394   : > { %v1436_v16 = vpop.permute.xlu1 %1435  ;;  %v1430_v17 = vpop.permute.xlu0 %1429 }
 0x395   : > { %v1442_v18 = vsel %vm1441_vm13, %v1430_v17, %v1436_v16  ;;  %1454 = vrot.lane.b32.xlu1 %v1449_v15, %s3211_s11  ;;  %1474 = vperm.xlu0 %3015, %v1449_v15  }
 0x396   : > { %v1446_v19 = vsel %vm251_vm14, %v1442_v18, -inf }
 0x397   : > { %v1448_v20 = vmax.f32 %v1425_v0, %v1446_v19 }
 0x399   : > { %1460 = vrot.lane.b32.xlu0 %v1449_v15, %s3212_s20  ;;  %1470 = vperm.xlu1 %3016, %v1448_v20  }
 0x39d   : > { %1458 = vrot.lane.b32.xlu0 %v1448_v20, %s3212_s20  ;;  %1452 = vrot.lane.b32.xlu1 %v1448_v20, %s3211_s11 }
 0x407   : > { %v1455_v24 = vpop.permute.xlu1 %1454 }
 0x410   : > { %v1475_v25 = vpop.permute.xlu0 %1474 }
 0x414   : > { %v1471_v26 = vpop.permute.xlu1 %1470  ;;  %v1461_v27 = vpop.permute.xlu0 %1460 }
 0x415   : > { %v1466_v28 = vsel %vm1464_vm15, %v1455_v24, %v1461_v27 }
 0x416   : > { %v1478_v30 = vsel %vm254_vm0, %v1466_v28, %v1475_v25 }
 0x417   : > { %v1480_v32 = vmax.f32 %v1449_v15, %v1478_v30 }
 0x418   : > { %v1453_v33 = vpop.permute.xlu1 %1452  ;;  %v1459_v34 = vpop.permute.xlu0 %1458 }
 0x419   : > { %v1510_v36 = vand.u32 4294901760, %v1480_v32  ;;  %v1465_v37 = vsel %vm1464_vm15, %v1453_v33, %v1459_v34 }
 0x41a   : > { %v1477_v38 = vsel %vm254_vm0, %v1465_v37, %v1471_v26 }
 0x41b   : > { %v1598_v39 = vsub.f32 %v1480_v32, %v1510_v36  ;;  %v1479_v40 = vmax.f32 %v1448_v20, %v1477_v38  ;;  %2819 = vmatprep.subr.mxu0 %v1510_v36 }
 0x41c   : > { %2820 = vmatpush3.msra.mxu0 %v1510_v36 }
 0x41d   : > { %v1513_v41 = vand.u32 4294901760, %v1479_v40  ;;  %v1599_v43 = vand.u32 4294901760, %v1598_v39 }
 0x41f   : > { %v1605_v44 = vsub.f32 %v1479_v40, %v1513_v41  ;;  %2821 = vmatprep.subr.mxu0 %v1513_v41  ;;  %v1600_v45 = vsub.f32 %v1598_v39, %v1599_v43 }
 0x420   : > { %2822 = vmatpush3.msra.mxu0 %v1513_v41 }
 0x421   : > { %2833 = vmatprep.subr.mxu0 %v1598_v39  ;;  %2824 = vmatmul.mubr.f32.vlgmr.msra.gmra.mxu0 %v3454_v56  ;;  %v1601_v29 = vand.u32 4294901760, %v1600_v45  ;;  %v1606_v46 = vand.u32 4294901760, %v1605_v44 }
 0x422   : > { %2834 = vmatpush3.msra.mxu0 %v1598_v39  ;;  %2837 = vmatprep.mubr.f32.mxu0 %v3420_v22 }
 0x423   : > { %2826 = vmatprep.subr.mxu1 %v1601_v29  ;;  %2835 = vmatprep.subr.mxu0 %v1605_v44  ;;  %v1607_v47 = vsub.f32 %v1605_v44, %v1606_v46 }
 0x424   : > { %2827 = vmatpush3.msra.mxu1 %v1601_v29  ;;  %2836 = vmatpush3.msra.mxu0 %v1605_v44 }
 0x425   : > { %2847 = vmatprep.subr.mxu0 %v1599_v43  ;;  %2838 = vmatmul.mubr.f32.vlgmr.msra.gmra.mxu0 %v3441_v35  ;;  %v1608_v48 = vand.u32 4294901760, %v1607_v47 }
 0x426   : > { %2848 = vmatpush3.msra.mxu0 %v1599_v43  ;;  %2851 = vmatprep.mubr.f32.mxu0 %v3415_v21 }
 0x427   : > { %2828 = vmatprep.subr.mxu1 %v1608_v48  ;;  %2849 = vmatprep.subr.mxu0 %v1606_v46 }
 0x428   : > { %2829 = vmatpush3.msra.mxu1 %v1608_v48  ;;  %2850 = vmatpush3.msra.mxu0 %v1606_v46 }
 0x429   : > { %2831 = vmatmul.mubr.f32.vlgmr.msra.gmra.mxu1 %v3436_v31  ;;  %2840 = vmatprep.subr.mxu1 %v1510_v36 }
 0x42a   : > { %2841 = vmatpush3.msra.mxu1 %v1510_v36  ;;  %2844 = vmatprep.mubr.f32.mxu1 %v3424_v23 }
 0x42b   : > { %2842 = vmatprep.subr.mxu1 %v1513_v41  ;;  %2852 = vmatmul.mubr.f32.vlgmr.msra.gmra.mxu0 %v3436_v31 }
 0x42c   : > { %2843 = vmatpush3.msra.mxu1 %v1513_v41  ;;  %2861 = vmatprep.subr.mxu0 %v3466_v3 }
 0x42d   : > { %2845 = vmatmul.mubr.f32.vlgmr.msra.gmra.mxu1 %v3448_v42  ;;  %2854 = vmatprep.subr.mxu1 %v1510_v36 }
 0x42e   : > { %2855 = vmatpush3.msra.mxu1 %v1510_v36  ;;  %2858 = vmatprep.mubr.f32.mxu1 %v3415_v21 }
 0x42f   : > { %2856 = vmatprep.subr.mxu1 %v1513_v41  ;;  %2862 = vmatpush3.msra.mxu0 %v3466_v3 }
 0x430   : > { %2857 = vmatpush3.msra.mxu1 %v1513_v41  ;;  %2863 = vmatprep.subr.mxu0 %v3471_v6 }
 0x431   : > { %2859 = vmatmul.mubr.f32.vlgmr.msra.gmra.mxu1 %v3436_v31  ;;  %2868 = vmatprep.subr.mxu1 %v3489_v11 }
 0x432   : > { %2869 = vmatpush3.msra.mxu1 %v3489_v11  ;;  %2864 = vmatpush3.msra.mxu0 %v3471_v6 }
 0x433   : > { %2870 = vmatprep.subr.mxu1 %v3494_v13  ;;  %2875 = vmatprep.subr.mxu0 %v3469_v5 }
 0x434   : > { %2871 = vmatpush3.msra.mxu1 %v3494_v13 }
 0x435   : > { %2882 = vmatprep.subr.mxu1 %v3466_v3 }
 0x4e1   : > { %v2825_v21 = vpop.f32.mrf.mxu0 }
 0x4e3   : > { %v1554_v22 = vpop.f32.mrf.mxu0 }
 0x4e5   : > { %v2839_v23 = vpop.f32.mrf.mxu0 }
 0x4e7   : > { %v1727_v42 = vpop.f32.mrf.mxu0 }
 0x4e9   : > { %v2832_v35 = vpop.f32.mrf.mxu1 }
 0x4ea   : > { %v1652_v31 = vadd.f32 %v2832_v35, %v2825_v21 }
 0x4eb   : > { %v1645_v56 = vpop.f32.mrf.mxu1  ;;  %v2853_v51 = vpop.f32.mrf.mxu0 }
 0x4ec   : > { %v1735_v49 = vadd.f32 %v2839_v23, %v1652_v31  ;;  %v1646_v50 = vadd.f32 %v1645_v56, %v1554_v22 }
 0x4ed   : > { %v2846_v11 = vpop.f32.mrf.mxu1  ;;  %v1894_v57 = vpop.f32.mrf.mxu0 }
 0x4ee   : > { %v1728_v52 = vadd.f32 %v1727_v42, %v1646_v50  ;;  %v1818_v53 = vadd.f32 %v2846_v11, %v1735_v49 }
 0x4ef   : > { %v1809_v2 = vpop.f32.mrf.mxu1 }
 0x4f0   : > { %v1901_v54 = vadd.f32 %v2853_v51, %v1818_v53  ;;  %v1810_v55 = vadd.f32 %v1809_v2, %v1728_v52 }
 0x4f1   : > { %v2860_v13 = vpop.f32.mrf.mxu1 }
 0x4f2   : > { %v1895_v1 = vadd.f32 %v1894_v57, %v1810_v55  ;;  %v1980_v58 = vadd.f32 %v2860_v13, %v1901_v54 }
 0x4f3   : > { %v1973_v59 = vpop.f32.mrf.mxu1 }
 0x4f4   : > { %v1987_v60 = vsel %vm335_vm4, %v1980_v58, 0  ;;  %v1974_v61 = vadd.f32 %v1973_v59, %v1895_v1 }
 0x4f5   : > { %v2066_v62 = vand.u32 4294901760, %v1987_v60 }
 0x4f6   : > { %v1984_v63 = vsel %vm335_vm4, %v1974_v61, 0 }
 0x4f7   : > { %v2067_v0 = vsub.f32 %v1987_v60, %v2066_v62  ;;  %v2056_v4 = vand.u32 4294901760, %v1984_v63 }
 0x4f9   : > { %v2057_v9 = vsub.f32 %v1984_v63, %v2056_v4  ;;  %2872 = vmatprep.mubr.f32.mxu1 %v2056_v4  ;;  %v2068_v12 = vand.u32 4294901760, %v2067_v0 }
 0x4fa   : > { %2873 = vmatmul.mubr.f32.vlgmr.msra.gmra.mxu1 %v2066_v62 }
 0x4fb   : > { %2883 = vmatpush3.msra.mxu1 %v3466_v3  ;;  %v2058_v14 = vand.u32 4294901760, %v2057_v9  ;;  %v2069_v15 = vsub.f32 %v2067_v0, %v2068_v12 }
 0x4fc   : > { %2884 = vmatprep.subr.mxu1 %v3471_v6 }
 0x4fd   : > { %2885 = vmatpush3.msra.mxu1 %v3471_v6  ;;  %2886 = vmatprep.mubr.f32.mxu1 %v2058_v14  ;;  %v2059_v16 = vsub.f32 %v2057_v9, %v2058_v14  ;;  %v2070_v18 = vand.u32 4294901760, %v2069_v15 }
 0x4fe   : > { %2887 = vmatmul.mubr.f32.vlgmr.msra.gmra.mxu1 %v2068_v12  ;;  %2896 = vmatprep.subr.mxu1 %v3466_v3 }
 0x4ff   : > { %2897 = vmatpush3.msra.mxu1 %v3466_v3  ;;  %2900 = vmatprep.mubr.f32.mxu1 %v2056_v4  ;;  %v2060_v17 = vand.u32 4294901760, %v2059_v16 }
 0x500   : > { %2898 = vmatprep.subr.mxu1 %v3471_v6 }
 0x501   : > { %2865 = vmatprep.mubr.f32.mxu0 %v2060_v17  ;;  %2899 = vmatpush3.msra.mxu1 %v3471_v6 }
 0x502   : > { %2866 = vmatmul.mubr.f32.vlgmr.msra.gmra.mxu0 %v2070_v18  ;;  %2901 = vmatmul.mubr.f32.vlgmr.msra.gmra.mxu1 %v2066_v62 }
 0x503   : > { %2876 = vmatpush3.msra.mxu0 %v3469_v5  ;;  %2879 = vmatprep.mubr.f32.mxu0 %v2057_v9 }
 0x504   : > { %2877 = vmatprep.subr.mxu0 %v3479_v8 }
 0x505   : > { %2878 = vmatpush3.msra.mxu0 %v3479_v8 }
 0x506   : > { %2880 = vmatmul.mubr.f32.vlgmr.msra.gmra.mxu0 %v2067_v0  ;;  %2889 = vmatprep.subr.mxu0 %v3476_v7 }
 0x507   : > { %2890 = vmatpush3.msra.mxu0 %v3476_v7  ;;  %2893 = vmatprep.mubr.f32.mxu0 %v2056_v4 }
 0x508   : > { %2891 = vmatprep.subr.mxu0 %v3486_v10 }
 0x509   : > { %2892 = vmatpush3.msra.mxu0 %v3486_v10 }
 0x50a   : > { %2894 = vmatmul.mubr.f32.vlgmr.msra.gmra.mxu0 %v2066_v62 }
 0x5ba   : > { %v2874_v3 = vpop.f32.mrf.mxu1 }
 0x5bc   : > { %v2153_v5 = vpop.f32.mrf.mxu1 }
 0x5be   : > { %v2888_v6 = vpop.f32.mrf.mxu1 }
 0x5c0   : > { %v2317_v8 = vpop.f32.mrf.mxu1 }
 0x5c2   : > { %v2867_v19 = vpop.f32.mrf.mxu0  ;;  %v2902_v32 = vpop.f32.mrf.mxu1 }
 0x5c3   : > { %v2160_v24 = vadd.f32 %v2874_v3, %v2867_v19 }
 0x5c4   : > { %v2062_v20 = vpop.f32.mrf.mxu0  ;;  %v2481_v39 = vpop.f32.mrf.mxu1 }
 0x5c5   : > { %v2154_v26 = vadd.f32 %v2153_v5, %v2062_v20 }
 0x5c6   : > { %v2881_v25 = vpop.f32.mrf.mxu0 }
 0x5c7   : > { %v2243_v27 = vadd.f32 %v2881_v25, %v2160_v24 }
 0x5c8   : > { %v2235_v7 = vpop.f32.mrf.mxu0 }
 0x5c9   : > { %v2236_v28 = vadd.f32 %v2235_v7, %v2154_v26  ;;  %v2326_v30 = vadd.f32 %v2888_v6, %v2243_v27 }
 0x5ca   : > { %v2895_v10 = vpop.f32.mrf.mxu0 }
 0x5cb   : > { %v2409_v33 = vadd.f32 %v2895_v10, %v2326_v30  ;;  %v2318_v34 = vadd.f32 %v2317_v8, %v2236_v28 }
 0x5cc   : > { %v2402_v36 = vpop.f32.mrf.mxu0 }
 0x5cd   : > { %v2488_v37 = vadd.f32 %v2902_v32, %v2409_v33  ;;  %v2403_v38 = vadd.f32 %v2402_v36, %v2318_v34 }
 0x5cf   : > { %2492 = vst.msk [vmem:[%s235_s7 + $0x8] sm:$0xff] %vm335_vm4, %v2488_v37  ;;  %v2482_v40 = vadd.f32 %v2481_v39, %v2403_v38 }
 0x5d1   : > { %2491 = vst.msk [vmem:[%s235_s7] sm:$0xff] %vm335_vm4, %v2482_v40 }
 0x5d2   : > { %3110 = shalt.err (!%p3107_p2)
}
 0x5d3   : > { %s3111_s22 = scalar_lea.hbm %s3580_s25, 256  ;;  %s3115_s10 = scalar_lea.hbm %s3667_s2, 2048 }
 0x5d4   : > { %p3112_p9 = scmp.ne.s32.totalorder %s3580_s25, %s3111_s22  ;;  %p3116_p13 = scmp.lt.s32.totalorder %s3580_s25, %s3667_s2 }
 0x5d5   : > { %p3117_p10 = scmp.lt.s32.totalorder %s3115_s10, %s3111_s22 }
 0x5d6   : > { %p3113_p11 = pnand %p3112_p9, %p3668_p4 }
 0x5d7   : > { %p3118_p7 = por %p3117_p10, %p3116_p13 }
 0x5d8   : > { %p3114_p12 = pneg %p3113_p11 }
 0x5da   : > { %p3119_p1 = pnand %p3118_p7, %p3114_p12 }
 0x5dc   : > { %3122 = shalt.err (!%p3119_p1)
}
 0x5dd   : > { %s3214_s23 = smov 128   ;;  %s3215_s29 = smov 8  }
 0x5de   : > { %2913 = dma.vmem_to_hbm [thread:$0]  (%p3668_p4), %s3582_s28, 256, %s3580_s25, %s2494_s30, %s3214_s23, %s3214_s23, %s3215_s29  }
 0x5df PF: > { %s3669_s8 = sld [smem:[#allocation12_spill]]  ;;  %p2935_p6 = scmp.ge.s32.totalorder %s3197_s19, 2 }
 0x5e0   : > { %s3670_s6 = sld [smem:[#allocation13_spill]] }
 0x5e5   : > { %s2524_s7 = sand.u32 1, %s3669_s8  }
 0x5e6   : > { %p3671_p8 = scmp.ne.s32.totalorder %s3670_s6, 0  ;;  %s2525_s15 = scalar_lea.sflag [#allocation4], %s2524_s7 }
 0x5e8   : > { %p2927_p3 = pnand %p2935_p6, %p3671_p8 }
 0x5ea   : > { %p2928_p0 = pneg %p2927_p3 }
 0x5ec   : > { %3164 = dma.done.wait (%p2928_p0), %s2525_s15, 256  }
 0x5ed   : > { %3166 = vsyncadd (%p2928_p0), %s2525_s15, 4294967040  ;;  %s20_s19 = sadd.s32 1, %s3197_s19   ;;  %s3672_s4 = sld [smem:[#allocation14_spill]] }
 0x5ee   : > { %p17_p5 = scmp.ge.s32.totalorder %s20_s19, 10   ;;  %s3673_s12 = smov %s3173_s13 }
 0x5ef   : > { %s3674_s13 = smov %s3177_s14  ;;  %s3675_s14 = smov %s3366_s1 }
 0x5f0   : > { %s3676_s15 = smov %s3189_s17  ;;  %s3677_s16 = smov %s3193_s18 }
 0x5f1   : > { %s3679_s18 = smov %s3685_s27  ;;  %19 = sbr.rel (!%p17_p5) target bundleno = 12 (0xc), region = 85 }
 0x5f3   : > { %s3678_s17 = smov %s3672_s4 }
 0x5f6   :  { %2530 = vsyncpa [#allocation3], 1 }
 0x5f7   :  { %2532 = vsyncpa [#allocation3 + $0x1], 1 }
 0x5f8   :  { %2533 = vsyncpa [#allocation6], 1 }
 0x5f9   :  { %2534 = vsyncpa [#allocation4], 1 }
 0x5fa   :  { %2536 = vsyncpa [#allocation4 + $0x1], 1 }

</bundles_post_ra>
